<compile_context>
chip_gen: v7x
topology: tpu7x:2x2x1
jax: 0.10.0
libtpu: 0.0.40
codegen_flags: <defaults>
</compile_context>

<pallas_src>
import jax
import jax.numpy as jnp
from jax.experimental import pallas as pl
from jax.experimental.pallas import tpu as pltpu

EPS = 1e-5

# Per-step (single-buffer) byte budget for the x-tile + out-tile pair (f32).
# Double-buffered this stays ~<= 8-10 MiB: safe under the 16 MiB default scoped
# VMEM on v5e and well under v7x's 32 MiB scoped / 64 MiB physical VMEM, so no
# explicit vmem_limit_bytes override is needed.
_TILE_BYTE_BUDGET = 4 * 1024 * 1024


def _round_up(x, m):
    return (x + m - 1) // m * m


def _pick_lane_tile(hw, c1, c2, max_lane_tile=None):
    """Largest multiple-of-128 lane tile under the byte budget.

    Prefers an exact divisor of hw (no padding) when hw is a multiple of 128
    and a >=512-lane divisor exists under the cap; otherwise pads the tail of
    the lane axis (padded columns are masked out of the stats).
    """
    bytes_per_lane = 4 * (c1 + c2)          # f32 x-tile column + out-tile column
    cap = max(128, (_TILE_BYTE_BUDGET // bytes_per_lane) // 128 * 128)
    if max_lane_tile is not None:
        cap = max(128, min(cap, (max_lane_tile // 128) * 128))
    hw128 = _round_up(hw, 128)
    if hw128 <= cap:
        return hw128                        # single tile (pads at most 127 lanes)
    if hw % 128 == 0:
        q = hw // 128
        for d in range(cap // 128, 3, -1):  # exact divisor, >= 512 lanes
            if q % d == 0:
                return d * 128
    return cap                              # pad the tail tile


def cssn_forward(x_nchw, conv_w, sn_gamma, sn_beta, mean_weight, var_weight,
                 *, stream_dtype=None, max_lane_tile=None):
    """x_nchw: (N, C1, H, W); conv_w: (C2, C1) or (C2, C1, 1, 1) 1x1 conv weight.

    stream_dtype: optional dtype (e.g. jnp.bfloat16) for the x/w streams fed to
    the kernels; MXU accumulation and all statistics stay f32.
    """
    N, C1, H, W = x_nchw.shape
    C2 = conv_w.shape[0]
    HW = H * W

    thw = _pick_lane_tile(HW, C1, C2, max_lane_tile)
    T_total = -(-HW // thw)                 # ceil
    HW_pad = T_total * thw
    # v7x: keep both TensorCores busy in pass 1 even at N=1-2 by splitting the
    # tile axis into (P parallel, T_inner arbitrary).
    if T_total % 2 == 0:
        P, T_inner = 2, T_total // 2
    else:
        P, T_inner = 1, T_total
    needs_mask = (HW % thw) != 0

    io_dtype = stream_dtype if stream_dtype is not None else jnp.float32
    x3 = x_nchw.reshape(N, C1, HW).astype(io_dtype)
    if HW_pad != HW:
        # Zero columns stay zero through the 1x1 conv; they are masked out of
        # the statistics and sliced off the pass-2 output.
        x3 = jnp.pad(x3, ((0, 0), (0, 0), (0, HW_pad - HW)))
    w = conv_w.reshape(C2, -1).astype(io_dtype)                 # (C2, C1)

    # ---- pass 1: per-(n, c2) mean / centered-M2 of y = conv1x1(x) -----------
    def stats_kernel(x_ref, w_ref, mean_ref, m2_ref):
        # x_ref: (C1, thw)   w_ref: (C2, C1)   mean_ref/m2_ref: (C2, 1)
        p = pl.program_id(1)
        t = pl.program_id(2)

        @pl.when(t == 0)
        def _():
            mean_ref[...] = jnp.zeros_like(mean_ref)
            m2_ref[...] = jnp.zeros_like(m2_ref)

        y = jnp.dot(w_ref[...], x_ref[...], preferred_element_type=jnp.float32)

        cell_start = p * (T_inner * thw)
        g_start = cell_start + t * thw
        if needs_mask:
            valid = HW - g_start                       # >= 1 by construction
            n_t = jnp.minimum(thw, valid).astype(jnp.float32)
            lane = jax.lax.broadcasted_iota(jnp.int32, (1, thw), 1)
            mask = lane < valid
            s_t = jnp.sum(jnp.where(mask, y, 0.0), axis=-1, keepdims=True)
            m_t = s_t / n_t
            d = jnp.where(mask, y - m_t, 0.0)
        else:
            n_t = jnp.float32(thw)
            s_t = jnp.sum(y, axis=-1, keepdims=True)
            m_t = s_t * (1.0 / thw)
            d = y - m_t
        m2_t = jnp.sum(d * d, axis=-1, keepdims=True)

        # Chan merge of (n_t, m_t, m2_t) into the running (n_a, mean, M2).
        n_a = jnp.clip(HW - cell_start, 0, t * thw).astype(jnp.float32)
        n_ab = n_a + n_t
        delta = m_t - mean_ref[...]
        mean_ref[...] = mean_ref[...] + delta * (n_t / n_ab)
        m2_ref[...] = m2_ref[...] + m2_t + (delta * delta) * (n_a * n_t / n_ab)

    x_spec1 = pl.BlockSpec((None, C1, thw), lambda n, p, t: (n, 0, p * T_inner + t))
    w_spec1 = pl.BlockSpec((C2, C1), lambda n, p, t: (0, 0))
    stat_spec1 = pl.BlockSpec((None, None, C2, 1), lambda n, p, t: (n, p, 0, 0))

    mean_p, m2_p = pl.pallas_call(
        stats_kernel,
        out_shape=(jax.ShapeDtypeStruct((N, P, C2, 1), jnp.float32),
                   jax.ShapeDtypeStruct((N, P, C2, 1), jnp.float32)),
        grid=(N, P, T_inner),
        in_specs=[x_spec1, w_spec1],
        out_specs=(stat_spec1, stat_spec1),
        compiler_params=pltpu.CompilerParams(
            dimension_semantics=("parallel", "parallel", "arbitrary")),
    )(x3, w)

    # ---- tiny (N, C2) SwitchNorm stat combine: wrapper-side glue -------------
    mean_p = mean_p[..., 0]                                     # (N, P, C2)
    m2_p = m2_p[..., 0]                                         # (N, P, C2)
    counts = [float(min(max(HW - p * T_inner * thw, 0), T_inner * thw))
              for p in range(P)]
    mean_in = mean_p[:, 0, :]
    m2 = m2_p[:, 0, :]
    n_a = counts[0]
    for p in range(1, P):                                       # Chan merge over P
        n_b = counts[p]
        n_ab = n_a + n_b
        delta = mean_p[:, p, :] - mean_in
        mean_in = mean_in + delta * (n_b / n_ab)
        m2 = m2 + m2_p[:, p, :] + delta * delta * (n_a * n_b / n_ab)
        n_a = n_ab

    var_in = m2 / (HW - 1.0)                                    # unbiased IN var
    temp = var_in + mean_in ** 2
    mean_ln = jnp.mean(mean_in, axis=1, keepdims=True)
    var_ln = jnp.mean(temp, axis=1, keepdims=True) - mean_ln ** 2
    mean_bn = jnp.mean(mean_in, axis=0, keepdims=True)
    var_bn = jnp.mean(temp, axis=0, keepdims=True) - mean_bn ** 2
    mw = jax.nn.softmax(mean_weight.astype(jnp.float32))
    vw = jax.nn.softmax(var_weight.astype(jnp.float32))
    mean = mw[0] * mean_in + mw[1] * mean_ln + mw[2] * mean_bn
    var = vw[0] * var_in + vw[1] * var_ln + vw[2] * var_bn
    gamma = sn_gamma.astype(jnp.float32)[None, :]
    beta = sn_beta.astype(jnp.float32)[None, :]
    scale = gamma * jax.lax.rsqrt(var + EPS)                    # (N, C2)
    bias = beta - mean * scale                                  # (N, C2)

    # ---- pass 2: fused conv1x1 + normalize/affine + SiLU, fully tiled --------
    def apply_kernel(x_ref, w_ref, scale_ref, bias_ref, o_ref):
        # x_ref: (C1, thw)  scale/bias: (C2, 1)  o_ref: (C2, thw)
        y = jnp.dot(w_ref[...], x_ref[...], preferred_element_type=jnp.float32)
        z = y * scale_ref[...] + bias_ref[...]
        # SiLU via tanh: z*sigmoid(z) == 0.5*z*(1+tanh(z/2)); one EUP op/elem.
        o_ref[...] = (0.5 * z * (1.0 + jnp.tanh(0.5 * z))).astype(o_ref.dtype)

    x_spec2 = pl.BlockSpec((None, C1, thw), lambda n, t: (n, 0, t))
    w_spec2 = pl.BlockSpec((C2, C1), lambda n, t: (0, 0))
    sb_spec2 = pl.BlockSpec((None, C2, 1), lambda n, t: (n, 0, 0))
    out_spec2 = pl.BlockSpec((None, C2, thw), lambda n, t: (n, 0, t))

    out3 = pl.pallas_call(
        apply_kernel,
        out_shape=jax.ShapeDtypeStruct((N, C2, HW_pad), jnp.float32),
        grid=(N, T_total),
        in_specs=[x_spec2, w_spec2, sb_spec2, sb_spec2],
        out_specs=out_spec2,
        compiler_params=pltpu.CompilerParams(
            dimension_semantics=("parallel", "parallel")),
    )(x3, w, scale.reshape(N, C2, 1), bias.reshape(N, C2, 1))

    if HW_pad != HW:
        out3 = out3[:, :, :HW]
    return out3.reshape(N, C2, H, W)


def cssn_reference(x_nchw, conv_w, sn_gamma, sn_beta, mean_weight, var_weight):
    """Pure-JAX reference matching the PyTorch forward (training-mode SN)."""
    N, C1, H, W = x_nchw.shape
    C2 = conv_w.shape[0]
    y = jnp.einsum("oc,nchw->nohw", conv_w.reshape(C2, -1), x_nchw)
    yv = y.reshape(N, C2, H * W)
    mean_in = yv.mean(-1, keepdims=True)
    var_in = ((yv - mean_in) ** 2).sum(-1, keepdims=True) / (H * W - 1)
    temp = var_in + mean_in ** 2
    mean_ln = mean_in.mean(1, keepdims=True)
    var_ln = temp.mean(1, keepdims=True) - mean_ln ** 2
    mean_bn = mean_in.mean(0, keepdims=True)
    var_bn = temp.mean(0, keepdims=True) - mean_bn ** 2
    mw = jax.nn.softmax(mean_weight)
    vw = jax.nn.softmax(var_weight)
    mean = mw[0] * mean_in + mw[1] * mean_ln + mw[2] * mean_bn
    var = vw[0] * var_in + vw[1] * var_ln + vw[2] * var_bn
    xhat = (yv - mean) / jnp.sqrt(var + EPS)
    z = xhat.reshape(N, C2, H, W) * sn_gamma[None, :, None, None] + \
        sn_beta[None, :, None, None]
    return z * jax.nn.sigmoid(z)


if __name__ == "__main__":
    def run_case(N, C1, C2, H, W, max_lane_tile=None, seed=0):
        key = jax.random.PRNGKey(seed)
        kx, kw = jax.random.split(key)
        x = jax.random.normal(kx, (N, C1, H, W), dtype=jnp.float32)
        conv_w = jax.random.normal(kw, (C2, C1), dtype=jnp.float32) * 0.5

        # SwitchNorm2d init: weight=1, bias=0, mean_weight=var_weight=ones(3)
        sn_gamma = jnp.ones((C2,), jnp.float32)
        sn_beta = jnp.zeros((C2,), jnp.float32)
        mean_weight = jnp.ones((3,), jnp.float32)
        var_weight = jnp.ones((3,), jnp.float32)

        out = cssn_forward(x, conv_w, sn_gamma, sn_beta, mean_weight, var_weight,
                           max_lane_tile=max_lane_tile)
        out = jax.block_until_ready(out)
        ref = cssn_reference(x, conv_w, sn_gamma, sn_beta, mean_weight, var_weight)
        assert out.shape == (N, C2, H, W)
        max_err = float(jnp.max(jnp.abs(out - ref)))
        assert jnp.allclose(out, ref, rtol=2e-5, atol=2e-5), \
            f"max abs err {max_err} for shape {(N, C1, H, W)}"

    # CSSN(c1=4, c2=8) with default k=1, s=1, g=1, act=True
    run_case(2, 4, 8, 16, 16)                       # primary shape (single tile)
    run_case(2, 4, 8, 14, 14)                       # HW not a multiple of 128 (masked tail)
    run_case(2, 4, 8, 32, 32, max_lane_tile=128)    # multi-tile + P-split + Chan merge path

    print("KERNEL_OK")
</pallas_src>

<mosaic_0001>
module attributes {stable_mosaic.version = 11 : i64} {
  func.func @stats_kernel(%arg0: i32, %arg1: i32, %arg2: i32, %arg3: memref<1x4x256xf32, #tpu.memory_space<vmem>>, %arg4: memref<8x4xf32, #tpu.memory_space<vmem>>, %arg5: memref<1x1x8x1xf32, #tpu.memory_space<vmem>>, %arg6: memref<1x1x8x1xf32, #tpu.memory_space<vmem>>) attributes {dimension_semantics = [#tpu.dimension_semantics<parallel>, #tpu.dimension_semantics<parallel>, #tpu.dimension_semantics<arbitrary>], iteration_bounds = array<i64: 2, 1, 1>, scalar_prefetch = 0 : i64, scratch_operands = 0 : i64, tpu.core_type = #tpu.core_type<tc>, window_params = [{transform_indices = @transform_0, window_bounds = array<i64: 1, 4, 256>}, {pipeline_mode = #tpu.pipeline_mode<synchronous>, transform_indices = @transform_1, window_bounds = array<i64: 8, 4>}, {transform_indices = @transform_2, window_bounds = array<i64: 1, 1, 8, 1>}, {transform_indices = @transform_3, window_bounds = array<i64: 1, 1, 8, 1>}]} {
    %c0_i32 = arith.constant 0 : i32
    %0 = arith.cmpi eq, %arg2, %c0_i32 : i32
    %1 = arith.extui %0 : i1 to i32
    %c0_i32_0 = arith.constant 0 : i32
    %2 = arith.cmpi ne, %1, %c0_i32_0 : i32
    scf.if %2 {
      %cst_34 = arith.constant 0.000000e+00 : f32
      %47 = vector.broadcast %cst_34 : f32 to vector<8x1xf32>
      %c0_35 = arith.constant 0 : index
      %c0_36 = arith.constant 0 : index
      %c0_37 = arith.constant 0 : index
      %c0_38 = arith.constant 0 : index
      %48 = vector.load %arg5[%c0_35, %c0_36, %c0_37, %c0_38] : memref<1x1x8x1xf32, #tpu.memory_space<vmem>>, vector<1x1x8x1xf32>
      %49 = vector.shape_cast %48 : vector<1x1x8x1xf32> to vector<8x1xf32>
      %50 = vector.shape_cast %47 : vector<8x1xf32> to vector<1x1x8x1xf32>
      tpu.vector_store %arg5[%c0_35, %c0_36, %c0_37, %c0_38], %50 {strides = array<i32>} : memref<1x1x8x1xf32, #tpu.memory_space<vmem>>, vector<1x1x8x1xf32>,
      %cst_39 = arith.constant 0.000000e+00 : f32
      %51 = vector.broadcast %cst_39 : f32 to vector<8x1xf32>
      %c0_40 = arith.constant 0 : index
      %c0_41 = arith.constant 0 : index
      %c0_42 = arith.constant 0 : index
      %c0_43 = arith.constant 0 : index
      %52 = vector.load %arg6[%c0_40, %c0_41, %c0_42, %c0_43] : memref<1x1x8x1xf32, #tpu.memory_space<vmem>>, vector<1x1x8x1xf32>
      %53 = vector.shape_cast %52 : vector<1x1x8x1xf32> to vector<8x1xf32>
      %54 = vector.shape_cast %51 : vector<8x1xf32> to vector<1x1x8x1xf32>
      tpu.vector_store %arg6[%c0_40, %c0_41, %c0_42, %c0_43], %54 {strides = array<i32>} : memref<1x1x8x1xf32, #tpu.memory_space<vmem>>, vector<1x1x8x1xf32>,
    } else {
    }
    %c0 = arith.constant 0 : index
    %c0_1 = arith.constant 0 : index
    %3 = vector.load %arg4[%c0, %c0_1] : memref<8x4xf32, #tpu.memory_space<vmem>>, vector<8x4xf32>
    %c0_2 = arith.constant 0 : index
    %c0_3 = arith.constant 0 : index
    %c0_4 = arith.constant 0 : index
    %4 = vector.load %arg3[%c0_2, %c0_3, %c0_4] : memref<1x4x256xf32, #tpu.memory_space<vmem>>, vector<1x4x256xf32>
    %5 = vector.shape_cast %4 : vector<1x4x256xf32> to vector<4x256xf32>
    %cst = arith.constant dense<0.000000e+00> : vector<8x256xf32>
    %6 = tpu.matmul %3, %5, %cst {dimension_numbers = #tpu.dot_dimension_numbers<[1], [0], [0], [1], [0, 0, 1, 1], [], []>} : vector<8x4xf32>, vector<4x256xf32>, vector<8x256xf32> -> vector<8x256xf32>
    %c256_i32 = arith.constant 256 : i32
    %7 = arith.muli %arg1, %c256_i32 : i32
    %cst_5 = arith.constant dense<0.000000e+00> : vector<8xf32>
    %8 = vector.multi_reduction <add>, %6, %cst_5 [1] : vector<8x256xf32> to vector<8xf32>
    %9 = vector.shape_cast %8 : vector<8xf32> to vector<8x1xf32>
    %cst_6 = arith.constant 3.906250e-03 : f32
    %10 = vector.broadcast %cst_6 : f32 to vector<8x1xf32>
    %11 = arith.mulf %9, %10 : vector<8x1xf32>
    %12 = vector.broadcast %11 : vector<8x1xf32> to vector<8x256xf32>
    %13 = arith.subf %6, %12 : vector<8x256xf32>
    %14 = arith.mulf %13, %13 : vector<8x256xf32>
    %cst_7 = arith.constant dense<0.000000e+00> : vector<8xf32>
    %15 = vector.multi_reduction <add>, %14, %cst_7 [1] : vector<8x256xf32> to vector<8xf32>
    %16 = vector.shape_cast %15 : vector<8xf32> to vector<8x1xf32>
    %c256_i32_8 = arith.constant 256 : i32
    %17 = arith.subi %c256_i32_8, %7 : i32
    %c256_i32_9 = arith.constant 256 : i32
    %18 = arith.muli %arg2, %c256_i32_9 : i32
    %c0_i32_10 = arith.constant 0 : i32
    %19 = arith.maxsi %c0_i32_10, %17 : i32
    %20 = arith.minsi %18, %19 : i32
    %21 = arith.sitofp %20 : i32 to f32
    %cst_11 = arith.constant 2.560000e+02 : f32
    %22 = arith.addf %21, %cst_11 : f32
    %c0_12 = arith.constant 0 : index
    %c0_13 = arith.constant 0 : index
    %c0_14 = arith.constant 0 : index
    %c0_15 = arith.constant 0 : index
    %23 = vector.load %arg5[%c0_12, %c0_13, %c0_14, %c0_15] : memref<1x1x8x1xf32, #tpu.memory_space<vmem>>, vector<1x1x8x1xf32>
    %24 = vector.shape_cast %23 : vector<1x1x8x1xf32> to vector<8x1xf32>
    %25 = arith.subf %11, %24 : vector<8x1xf32>
    %c0_16 = arith.constant 0 : index
    %c0_17 = arith.constant 0 : index
    %c0_18 = arith.constant 0 : index
    %c0_19 = arith.constant 0 : index
    %26 = vector.load %arg5[%c0_16, %c0_17, %c0_18, %c0_19] : memref<1x1x8x1xf32, #tpu.memory_space<vmem>>, vector<1x1x8x1xf32>
    %27 = vector.shape_cast %26 : vector<1x1x8x1xf32> to vector<8x1xf32>
    %cst_20 = arith.constant 2.560000e+02 : f32
    %28 = arith.divf %cst_20, %22 : f32
    %29 = vector.broadcast %28 : f32 to vector<8x1xf32>
    %30 = arith.mulf %25, %29 : vector<8x1xf32>
    %31 = arith.addf %27, %30 : vector<8x1xf32>
    %c0_21 = arith.constant 0 : index
    %c0_22 = arith.constant 0 : index
    %c0_23 = arith.constant 0 : index
    %c0_24 = arith.constant 0 : index
    %32 = vector.load %arg5[%c0_21, %c0_22, %c0_23, %c0_24] : memref<1x1x8x1xf32, #tpu.memory_space<vmem>>, vector<1x1x8x1xf32>
    %33 = vector.shape_cast %32 : vector<1x1x8x1xf32> to vector<8x1xf32>
    %34 = vector.shape_cast %31 : vector<8x1xf32> to vector<1x1x8x1xf32>
    tpu.vector_store %arg5[%c0_21, %c0_22, %c0_23, %c0_24], %34 {strides = array<i32>} : memref<1x1x8x1xf32, #tpu.memory_space<vmem>>, vector<1x1x8x1xf32>,
    %c0_25 = arith.constant 0 : index
    %c0_26 = arith.constant 0 : index
    %c0_27 = arith.constant 0 : index
    %c0_28 = arith.constant 0 : index
    %35 = vector.load %arg6[%c0_25, %c0_26, %c0_27, %c0_28] : memref<1x1x8x1xf32, #tpu.memory_space<vmem>>, vector<1x1x8x1xf32>
    %36 = vector.shape_cast %35 : vector<1x1x8x1xf32> to vector<8x1xf32>
    %37 = arith.addf %36, %16 : vector<8x1xf32>
    %38 = arith.mulf %25, %25 : vector<8x1xf32>
    %cst_29 = arith.constant 2.560000e+02 : f32
    %39 = arith.mulf %21, %cst_29 : f32
    %40 = arith.divf %39, %22 : f32
    %41 = vector.broadcast %40 : f32 to vector<8x1xf32>
    %42 = arith.mulf %38, %41 : vector<8x1xf32>
    %43 = arith.addf %37, %42 : vector<8x1xf32>
    %c0_30 = arith.constant 0 : index
    %c0_31 = arith.constant 0 : index
    %c0_32 = arith.constant 0 : index
    %c0_33 = arith.constant 0 : index
    %44 = vector.load %arg6[%c0_30, %c0_31, %c0_32, %c0_33] : memref<1x1x8x1xf32, #tpu.memory_space<vmem>>, vector<1x1x8x1xf32>
    %45 = vector.shape_cast %44 : vector<1x1x8x1xf32> to vector<8x1xf32>
    %46 = vector.shape_cast %43 : vector<8x1xf32> to vector<1x1x8x1xf32>
    tpu.vector_store %arg6[%c0_30, %c0_31, %c0_32, %c0_33], %46 {strides = array<i32>} : memref<1x1x8x1xf32, #tpu.memory_space<vmem>>, vector<1x1x8x1xf32>,
    return
  }
  func.func @transform_0(%arg0: i32, %arg1: i32, %arg2: i32) -> (i32, i32, i32) {
    %c1_i32 = arith.constant 1 : i32
    %0 = arith.muli %arg1, %c1_i32 : i32
    %1 = arith.addi %0, %arg2 : i32
    %c0_i32 = arith.constant 0 : i32
    %c0_i32_0 = arith.constant 0 : i32
    return %arg0, %c0_i32, %1 : i32, i32, i32
  }
  func.func @transform_1(%arg0: i32, %arg1: i32, %arg2: i32) -> (i32, i32) {
    %c0_i32 = arith.constant 0 : i32
    %c0_i32_0 = arith.constant 0 : i32
    %c0_i32_1 = arith.constant 0 : i32
    return %c0_i32, %c0_i32_0 : i32, i32
  }
  func.func @transform_2(%arg0: i32, %arg1: i32, %arg2: i32) -> (i32, i32, i32, i32) {
    %c0_i32 = arith.constant 0 : i32
    %c0_i32_0 = arith.constant 0 : i32
    %c0_i32_1 = arith.constant 0 : i32
    return %arg0, %arg1, %c0_i32, %c0_i32_0 : i32, i32, i32, i32
  }
  func.func @transform_3(%arg0: i32, %arg1: i32, %arg2: i32) -> (i32, i32, i32, i32) {
    %c0_i32 = arith.constant 0 : i32
    %c0_i32_0 = arith.constant 0 : i32
    %c0_i32_1 = arith.constant 0 : i32
    return %arg0, %arg1, %c0_i32, %c0_i32_0 : i32, i32, i32, i32
  }
}

</mosaic_0001>

<bundles_post_ra>
// kernel: tpu_custom_call.1
= control target key start
LH: loop header
LB: loop body
LE: loop exit
PB: predicated region body
PF: predicated region fallthrough
CT: control target
= control target key end

     0   :  { %9 = vsyncpa [#allocation3], 0  ;;  %s820_s0 = inlined_call_operand.hbm [shape: f32[2,4,256], index: 0, kind: input, shape index: {}]   ;;  %s821_s1 = inlined_call_operand.vmem [shape: f32[8,4], index: 1, kind: input, shape index: {}]   ;;  %s822_s2 = inlined_call_operand.vmem [shape: f32[2,1,8,1], index: 2, kind: output, shape index: {0}]   ;;  %s823_s3 = inlined_call_operand.vmem [shape: f32[2,1,8,1], index: 3, kind: output, shape index: {1}]  }
   0x1   :  { %11 = vsyncpa [#allocation3 + $0x1], 0  ;;  %s685_s12 = smov 0   ;;  %s687_s13 = smov 0  }
   0x2   :  { %s689_s14 = smov 0   ;;  %s691_s15 = smov 0  }
   0x3   :  { %s693_s16 = smov 0   ;;  %s695_s17 = smov 0  }
   0x4 LB: > { %s507_s18 = sadd.s32 4294967295, %s661_s17   ;;  %s36_s19 = sadd.s32 1, %s657_s16  ;;  %s661_s17 = sphi %s695_s17, %s17_s17   ;;  %s657_s16 = sphi %s693_s16, %s833_s16   ;;  %s653_s15 = sphi %s691_s15, %s832_s15   ;;  %s649_s14 = sphi %s689_s14, %s831_s14   ;;  %s645_s13 = sphi %s687_s13, %s830_s13   ;;  %s641_s12 = sphi %s685_s12, %s829_s12  }
   0x5   : > { %p38_p0 = scmp.ge.s32.totalorder %s36_s19, 2  ;;  %s47_s20 = sadd.s32 1, %s649_s14 }
   0x6   : > { %p54_p1 = scmp.ne.s32.totalorder %s649_s14, %s645_s13  ;;  %p55_p2 = scmp.eq.s32.totalorder %s661_s17, 0 }
   0x7   : > { %s835_s19 = smov (%p38_p0, %s36_s19), 0  ;;  %p60_p4 = scmp.ne.s32.totalorder %s645_s13, %s641_s12 }
   0x8   : > { %p721_p3 = por %p55_p2, %p54_p1  ;;  %s42_s22 = ssub.s32 %s657_s16, %s835_s19 }
   0x9   : > { %p61_p5 = scmp.eq.s32.totalorder %s507_s18, 0  ;;  %p45_p6 = scmp.eq.s32.totalorder %s42_s22, 0 }
   0xa   : > { %p530_p8 = scmp.lt.s32.totalorder %s661_s17, 2  ;;  %s164_s25 = sand.u32 1, %s649_s14  }
   0xb   : > { %p728_p7 = por %p61_p5, %p60_p4  ;;  %s523_s26 = sshll.u32 %s657_s16, 7 }
   0xc   : > { %s734_s24 = scalar_select %p45_p6, %s649_s14, %s47_s20  }
   0xd   : > { %s511_s27 = sshll.u32 %s164_s25, 3  ;;  %s741_s30 = scalar_lea.hbm %s820_s0, %s523_s26 }
   0xe   : > { %s168_s4 = scalar_lea.vmem [#allocation2], %s511_s27  ;;  %p745_p9 = pnand %p530_p8, %p721_p3 }
   0xf   : > { %s179_s5 = sshll.u32 %s168_s4, 4  ;;  %s165_s7 = scalar_lea.sflag [#allocation3], %s164_s25  ;;  %s749_s5 = int_to_ptr.vmem [resolvable:$true] %s179_s5 }
  0x10   : > { %s581_s8 = scalar_lea.hbm %s741_s30, 128  ;;  %p583_p13 = pneg %p745_p9 }
  0x11   : > { %p582_p12 = scmp.ne.s32.totalorder %s741_s30, %s581_s8  ;;  %s586_s11 = scalar_lea.hbm %s820_s0, 256 }
  0x12   : > { %p587_p2 = scmp.lt.u32.totalorder %s741_s30, %s820_s0  ;;  %p588_p3 = scmp.lt.u32.totalorder %s586_s11, %s581_s8 }
  0x13   : > { %p584_p0 = pnand %p583_p13, %p582_p12  ;;  %p590_p5 = scmp.lt.u32.totalorder %s581_s8, %s741_s30 }
  0x14   : > { %p589_p4 = por %p588_p3, %p587_p2 }
  0x15   : > { %p585_p1 = pneg %p584_p0 }
  0x16   : > { %p591_p6 = por %p590_p5, %p589_p4 }
  0x18   : > { %p592_p8 = pnand %p591_p6, %p585_p1 }
  0x1a   : > { %595 = shalt.err (!%p592_p8)
}
  0x1b   : > { %s596_s20 = scalar_lea.vmem %s749_s5, 128  ;;  %s663_s21 = smov [#allocation2]  }
  0x1c   : > { %p597_p12 = scmp.ne.s32.totalorder %s749_s5, %s596_s20  ;;  %s601_s22 = sshll.u32 %s663_s21, 4  ;;  %s602_s22 = int_to_ptr.vmem [resolvable:$false] %s601_s22 }
  0x1d   : > { %s603_s25 = scalar_lea.vmem %s602_s22, 256  ;;  %p604_p11 = scmp.lt.s32.totalorder %s749_s5, %s602_s22 }
  0x1e   : > { %p599_p0 = pnand %p597_p12, %p583_p13  ;;  %p605_p2 = scmp.lt.s32.totalorder %s603_s25, %s596_s20 }
  0x20   : > { %p600_p10 = pneg %p599_p0  ;;  %p606_p3 = por %p605_p2, %p604_p11 }
  0x22   : > { %p607_p4 = pnand %p606_p3, %p600_p10 }
  0x24   : > { %610 = shalt.err (!%p607_p4)
}
  0x25   : > { %529 = dma.hbm_to_vmem [thread:$0]  (!%p745_p9), %s741_s30, 128, %s749_s5, %s165_s7  }
  0x26   : > { %p827_p1 = scmp.lt.s32.totalorder %s661_s17, 3  ;;  %p828_p5 = scmp.ge.s32.totalorder %s661_s17, 1 }
  0x28   : > { %p185_p13 = pnand %p828_p5, %p827_p1 }
  0x29   : > { %s190_s26 = sand.u32 (!%p185_p13), 1, %s645_s13  }
  0x2a   : > { %188 = sbr.rel (%p185_p13) target bundleno = 567 (0x237), region = 28  ;;  %s515_s27 = sshll.u32 (!%p185_p13), %s190_s26, 3 }
  0x2b   : > { %s191_s28 = scalar_lea.sflag (!%p185_p13), [#allocation3], %s190_s26  ;;  %s194_s29 = scalar_lea.vmem (!%p185_p13), [#allocation2], %s515_s27 }
  0x31   : > { %636 = dma.done.wait (%p728_p7), %s191_s28, 128  }
  0x32   : > { %638 = vsyncadd (%p728_p7), %s191_s28, 4294967168  ;;  %v664_v0 = vmov 0.0   ;;  %v250_v1 = vld [vmem:[%s194_s29] sm:$0xff]  ;;  %vm257_vm0 = vcmask 1043456   ;;  %vm253_vm1 = vcmask 31744   ;;  %p228_p7 = scmp.lt.s32.totalorder %s653_s15, 1 }
  0x33   : > { %326 = vmatprep.mubr.f32.mxu0 %v664_v0  ;;  %v252_v2 = vcombine.high %v250_v1, %v250_v1  ;;  %v249_v3 = vld [vmem:[%s821_s1] sm:$0xff]  ;;  %vm246_vm2 = vcmask 7168  }
  0x34   : > { %s837_s15 = smov (!%p228_p7, %s653_s15), 1 }
  0x35   : > { %518 = vmatprep.subr.msk.mxu0 %vm257_vm0, %v252_v2  ;;  %s516_s23 = sshll.u32 %s837_s15, 3 }
  0x36   : > { %519 = vmatpush1.msk.msra.mxu0 %vm257_vm0, %v250_v1  ;;  %s234_s7 = scalar_lea.vmem %s822_s2, %s516_s23  ;;  %s241_s10 = scalar_lea.vmem %s823_s3, %s516_s23 }
  0x37   : > { %520 = vmatmul.mubr.msk.f32.vlgmr.msra.gmra.mrb[0].mxu0 %vm253_vm1, %v249_v3  ;;  %247 = vst.msk [vmem:[%s234_s7] sm:$0xff] %vm246_vm2, %v664_v0  ;;  %248 = vst.msk [vmem:[%s241_s10] sm:$0xff] %vm246_vm2, %v664_v0 }
  0x3e   : > { %v353_v8 = vld [vmem:[%s234_s7] sm:$0xff] }
  0x3f   : > { %v364_v18 = vld [vmem:[%s241_s10] sm:$0xff] }
 0x10a   : > { %v328_v4 = vpop.f32.mrb[0].mxu0 }
 0x10b   : > { %v330_v5 = vpop.f32.mrb[1].mxu0 }
 0x10c   : > { %v334_v6 = vadd.f32 %v330_v5, %v328_v4 }
 0x10e   : > { %335 = vadd.xlane.f32.xlu0 %v334_v6 }
 0x19b   : > { %v336_v7 = vpop.xlane.xlu0 %335 }
 0x19c   : > { %v337_v9 = vmul.f32 0.00390625, %v336_v7 }
 0x19e   : > { %v338_v10 = vsub.f32 %v328_v4, %v337_v9  ;;  %v339_v11 = vsub.f32 %v330_v5, %v337_v9  ;;  %v354_v12 = vsub.f32 %v337_v9, %v353_v8 }
 0x1a0   : > { %v340_v13 = vmul.f32 %v338_v10, %v338_v10  ;;  %v341_v14 = vmul.f32 %v339_v11, %v339_v11  ;;  %v361_v15 = vadd.f32 %v354_v12, %v353_v8  ;;  %v366_v17 = vmul.f32 %v354_v12, %v354_v12 }
 0x1a2   : > { %v342_v16 = vadd.f32 %v341_v14, %v340_v13  ;;  %363 = vst.msk [vmem:[%s234_s7] sm:$0xff] %vm246_vm2, %v361_v15  ;;  %v373_v21 = vmul.f32 0.0, %v366_v17 }
 0x1a4   : > { %343 = vadd.xlane.f32.xlu0 %v342_v16 }
 0x231   : > { %v344_v19 = vpop.xlane.xlu0 %343 }
 0x232   : > { %v365_v20 = vadd.f32 %v364_v18, %v344_v19 }
 0x234   : > { %v374_v22 = vadd.f32 %v373_v21, %v365_v20 }
 0x236   : > { %375 = vst.msk [vmem:[%s241_s10] sm:$0xff] %vm246_vm2, %v374_v22 }
 0x237 PF: > { %s17_s17 = sadd.s32 1, %s661_s17   ;;  %s829_s12 = smov %s645_s13 }
 0x238   : > { %p14_p9 = scmp.ge.s32.totalorder %s17_s17, 4   ;;  %s830_s13 = smov %s649_s14 }
 0x239   : > { %s831_s14 = smov %s734_s24  ;;  %s832_s15 = smov %s657_s16 }
 0x23a   : > { %s833_s16 = smov %s835_s19  ;;  %16 = sbr.rel (!%p14_p9) target bundleno = 4 (0x4), region = 84 }
 0x241   :  { %421 = vsyncpa [#allocation3], 1 }
 0x242   :  { %423 = vsyncpa [#allocation3 + $0x1], 1 }

</bundles_post_ra>
